<compile_context>
chip_gen: v7x
topology: tpu7x:2x2x1
jax: 0.10.0
libtpu: 0.0.40
codegen_flags: <defaults>
</compile_context>

<pallas_src>
import jax
import jax.numpy as jnp
from jax.experimental import pallas as pl
from jax.experimental.pallas import tpu as pltpu

HIDDEN = 256


def decoder_kernel(x_ref, w1_ref, b1_ref, w2_ref, b2_ref, o_ref):
    # Load the f32 activation tile and cast to bf16 in-register (VPU) right before
    # the MXU pass -- avoids a separate wrapper-side convert pass over HBM.
    x_bf = x_ref[...].astype(jnp.bfloat16)
    # 1st linear: bf16 x bf16 -> f32 accumulation on the MXU.
    h = jnp.dot(x_bf, w1_ref[...], preferred_element_type=jnp.float32)
    # Bias add + ReLU in f32 on the VPU (v5e has no bf16 VALU, so stay in f32).
    h = jnp.maximum(h + b1_ref[...], 0.0)
    # 2nd linear: downcast hidden to bf16 for the MXU, accumulate in f32 again.
    y = jnp.dot(h.astype(w2_ref.dtype), w2_ref[...],
                preferred_element_type=jnp.float32)
    y = y + b2_ref[...]
    o_ref[...] = y.astype(o_ref.dtype)


def prepare_decoder_params(w1, b1, w2, b2):
    """One-time parameter prep (do NOT call per forward):
       - cast weights to bf16 (MXU storage dtype), biases to f32, shape (1, N);
       - pad the output feature dim to a multiple of 128 so the kernel's output
         stores stay lane-dense (zero-padding keeps the math identical)."""
    out_size = w2.shape[1]
    pad = (-out_size) % 128
    b1 = b1.reshape(1, -1)
    b2 = b2.reshape(1, -1)
    if pad:
        w2 = jnp.pad(w2, ((0, 0), (0, pad)))
        b2 = jnp.pad(b2, ((0, 0), (0, pad)))
    return (w1.astype(jnp.bfloat16), b1.astype(jnp.float32),
            w2.astype(jnp.bfloat16), b2.astype(jnp.float32), out_size)


def _vmem_plan(in_size, out_p):
    """Generation-aware VMEM planning. Returns (physical, usable, resident_bytes,
    per-step tile budget)."""
    try:
        phys = int(pltpu.get_tpu_info().vmem_capacity_bytes)
    except Exception:
        phys = 64 << 20  # assume the smallest per-core VMEM (v7x) if detection fails
    # Weights/biases held once (single-buffered invariant blocks).
    resident = (in_size * HIDDEN + HIDDEN * out_p) * 2 + (HIDDEN + out_p) * 4
    usable = int(phys * 0.6)  # headroom for compiler scratch / un-modeled buffers
    per_gen_cap = (32 << 20) if phys <= (64 << 20) else (64 << 20)
    tile_budget = max(4 << 20, min(per_gen_cap, usable - resident - (4 << 20)))
    return phys, usable, resident, tile_budget


def _choose_batch_tile(batch, per_row_bytes, tile_budget_bytes, max_tile=4096):
    """Largest batch tile: a multiple of 16 (bf16 (16,128) sublane packing),
    capped at max_tile rows and the per-step VMEM tile budget, floored at 16."""
    by_budget = max(16, (tile_budget_bytes // max(per_row_bytes, 1)) // 16 * 16)
    tb = int(min(max_tile, by_budget))
    if batch <= tb:
        return batch  # a block equal to the full array extent is always legal
    return tb


def _pallas_decoder_call(x, w1, b1, w2, b2, *, tb, grid, out_dtype, out_p,
                         vmem_limit, flops, bytes_accessed):
    B, in_size = x.shape

    def build(invariant_mode):
        extra = {} if invariant_mode is None else {"pipeline_mode": invariant_mode}
        in_specs = [
            pl.BlockSpec((tb, in_size), lambda i: (i, 0)),               # x (pipelined)
            pl.BlockSpec((in_size, HIDDEN), lambda i: (0, 0), **extra),  # W1 (resident)
            pl.BlockSpec((1, HIDDEN), lambda i: (0, 0), **extra),        # b1 (resident)
            pl.BlockSpec((HIDDEN, out_p), lambda i: (0, 0), **extra),    # W2 (resident)
            pl.BlockSpec((1, out_p), lambda i: (0, 0), **extra),         # b2 (resident)
        ]
        return pl.pallas_call(
            decoder_kernel,
            out_shape=jax.ShapeDtypeStruct((B, out_p), out_dtype),
            grid=grid,
            in_specs=in_specs,
            out_specs=pl.BlockSpec((tb, out_p), lambda i: (i, 0)),
            compiler_params=pltpu.CompilerParams(
                # NOTE: CORE_PARALLEL could split batch tiles across v7x's 2 TCs once
                # the grid has >= 2 steps; plain "parallel" is the safe default here.
                dimension_semantics=("parallel",),
                vmem_limit_bytes=vmem_limit),
            cost_estimate=pl.CostEstimate(
                flops=flops, transcendentals=0, bytes_accessed=bytes_accessed),
        )

    try:
        # Single-buffer the grid-invariant weight/bias blocks (constant index_map):
        # frees the VMEM that default double-buffering would waste.
        return build(pl.Buffered(1))(x, w1, b1, w2, b2)
    except Exception:
        # Fallback: default pipelining if Buffered(1) is rejected by this JAX build.
        return build(None)(x, w1, b1, w2, b2)


def decoder_forward(x, params, *, out_dtype=jnp.bfloat16):
    """x: (B, input_size) f32 (or bf16), params from prepare_decoder_params.
    Returns (B, output_size) in out_dtype (bf16 by default to halve writeback)."""
    w1, b1, w2, b2, out_size = params
    B, in_size = x.shape
    out_p = w2.shape[1]  # padded (multiple of 128)

    x_bytes = jnp.dtype(x.dtype).itemsize
    out_bytes = jnp.dtype(out_dtype).itemsize

    _, usable, resident, tile_budget = _vmem_plan(in_size, out_p)
    # Per-row VMEM: double-buffered x/out tiles + in-kernel f32 hidden, its bf16
    # copy, and the f32 output tile before downcast.
    per_row = (2 * (in_size * x_bytes + out_p * out_bytes)
               + HIDDEN * (4 + 2)
               + out_p * 4)
    tb = _choose_batch_tile(B, per_row, tile_budget)
    grid = (pl.cdiv(B, tb),)

    need = resident + tb * per_row
    vmem_limit = int(min(usable, max(32 << 20, int(1.25 * need) + (2 << 20))))

    flops = 2 * B * (in_size * HIDDEN + HIDDEN * out_p)
    bytes_accessed = (x.size * x_bytes + w1.size * 2 + w2.size * 2
                      + b1.size * 4 + b2.size * 4 + B * out_p * out_bytes)

    out = _pallas_decoder_call(x, w1, b1, w2, b2, tb=tb, grid=grid,
                               out_dtype=out_dtype, out_p=out_p,
                               vmem_limit=vmem_limit, flops=flops,
                               bytes_accessed=bytes_accessed)
    if out_p != out_size:
        out = out[:, :out_size]
    return out


def init_decoder_params(key, input_size, output_size, dtype=jnp.float32):
    """Deterministic init matching the PyTorch module:
       - weights: xavier_normal_ (std = sqrt(2 / (fan_in + fan_out)))
       - biases:  PyTorch Linear default uniform(-1/sqrt(fan_in), 1/sqrt(fan_in))."""
    k1, k2, k3, k4 = jax.random.split(key, 4)

    std1 = (2.0 / (input_size + HIDDEN)) ** 0.5
    w1 = std1 * jax.random.normal(k1, (input_size, HIDDEN), dtype)
    bnd1 = 1.0 / (input_size ** 0.5)
    b1 = jax.random.uniform(k2, (1, HIDDEN), dtype, -bnd1, bnd1)

    std2 = (2.0 / (HIDDEN + output_size)) ** 0.5
    w2 = std2 * jax.random.normal(k3, (HIDDEN, output_size), dtype)
    bnd2 = 1.0 / (HIDDEN ** 0.5)
    b2 = jax.random.uniform(k4, (1, output_size), dtype, -bnd2, bnd2)

    return w1, b1, w2, b2


if __name__ == "__main__":
    key = jax.random.PRNGKey(0)
    batch = 16
    input_size = 128    # bottleneck feature size
    output_size = 256   # decoded (flattened) output size

    k_x, k_p = jax.random.split(key)
    x = jax.random.normal(k_x, (batch, input_size), jnp.float32)
    w1, b1, w2, b2 = init_decoder_params(k_p, input_size, output_size)

    params = prepare_decoder_params(w1, b1, w2, b2)   # one-time cast/pad, reuse per call
    out = decoder_forward(x, params)                  # bf16 output by default
    out = jax.block_until_ready(out)

    # Reference with the same bf16-storage / f32-accumulate numerics as the kernel.
    # (Contract: bf16 MXU operands + f32 accumulation, ~2e-2 vs a pure-f32 PyTorch run.)
    w1_bf, b1_f32, w2_bf, b2_f32, _ = params
    x_bf = x.astype(jnp.bfloat16)
    h_ref = jnp.maximum(
        jnp.dot(x_bf, w1_bf, preferred_element_type=jnp.float32) + b1_f32, 0.0)
    ref = jnp.dot(h_ref.astype(jnp.bfloat16), w2_bf,
                  preferred_element_type=jnp.float32) + b2_f32

    assert out.shape == (batch, output_size)
    assert out.dtype == jnp.bfloat16
    assert jnp.allclose(out.astype(jnp.float32), ref, atol=3e-2, rtol=3e-2)

    print("KERNEL_OK")
</pallas_src>

<mosaic_0001>
module attributes {stable_mosaic.version = 11 : i64} {
  func.func @decoder_kernel(%arg0: i32, %arg1: memref<16x128xf32, #tpu.memory_space<vmem>>, %arg2: memref<128x256xbf16, #tpu.memory_space<vmem>>, %arg3: memref<1x256xf32, #tpu.memory_space<vmem>>, %arg4: memref<256x256xbf16, #tpu.memory_space<vmem>>, %arg5: memref<1x256xf32, #tpu.memory_space<vmem>>, %arg6: memref<16x256xbf16, #tpu.memory_space<vmem>>) attributes {dimension_semantics = [#tpu.dimension_semantics<parallel>], iteration_bounds = array<i64: 1>, scalar_prefetch = 0 : i64, scratch_operands = 0 : i64, tpu.core_type = #tpu.core_type<tc>, window_params = [{transform_indices = @transform_0, window_bounds = array<i64: 16, 128>}, {pipeline_mode = #tpu.pipeline_mode<synchronous>, transform_indices = @transform_1, window_bounds = array<i64: 128, 256>}, {pipeline_mode = #tpu.pipeline_mode<synchronous>, transform_indices = @transform_2, window_bounds = array<i64: 1, 256>}, {pipeline_mode = #tpu.pipeline_mode<synchronous>, transform_indices = @transform_3, window_bounds = array<i64: 256, 256>}, {pipeline_mode = #tpu.pipeline_mode<synchronous>, transform_indices = @transform_4, window_bounds = array<i64: 1, 256>}, {transform_indices = @transform_5, window_bounds = array<i64: 16, 256>}]} {
    %c0 = arith.constant 0 : index
    %c0_0 = arith.constant 0 : index
    %0 = vector.load %arg1[%c0, %c0_0] : memref<16x128xf32, #tpu.memory_space<vmem>>, vector<16x128xf32>
    %1 = arith.truncf %0 : vector<16x128xf32> to vector<16x128xbf16>
    %c0_1 = arith.constant 0 : index
    %c0_2 = arith.constant 0 : index
    %2 = vector.load %arg2[%c0_1, %c0_2] : memref<128x256xbf16, #tpu.memory_space<vmem>>, vector<128x256xbf16>
    %cst = arith.constant dense<0.000000e+00> : vector<16x256xf32>
    %3 = tpu.matmul %1, %2, %cst {dimension_numbers = #tpu.dot_dimension_numbers<[1], [0], [0], [1], [0, 0, 1, 1], [], []>} : vector<16x128xbf16>, vector<128x256xbf16>, vector<16x256xf32> -> vector<16x256xf32>
    %c0_3 = arith.constant 0 : index
    %c0_4 = arith.constant 0 : index
    %4 = vector.load %arg3[%c0_3, %c0_4] : memref<1x256xf32, #tpu.memory_space<vmem>>, vector<1x256xf32>
    %5 = vector.broadcast %4 : vector<1x256xf32> to vector<16x256xf32>
    %6 = arith.addf %3, %5 : vector<16x256xf32>
    %cst_5 = arith.constant 0.000000e+00 : f32
    %7 = vector.broadcast %cst_5 : f32 to vector<16x256xf32>
    %8 = arith.maximumf %6, %7 : vector<16x256xf32>
    %9 = arith.truncf %8 : vector<16x256xf32> to vector<16x256xbf16>
    %c0_6 = arith.constant 0 : index
    %c0_7 = arith.constant 0 : index
    %10 = vector.load %arg4[%c0_6, %c0_7] : memref<256x256xbf16, #tpu.memory_space<vmem>>, vector<256x256xbf16>
    %cst_8 = arith.constant dense<0.000000e+00> : vector<16x256xf32>
    %11 = tpu.matmul %9, %10, %cst_8 {dimension_numbers = #tpu.dot_dimension_numbers<[1], [0], [0], [1], [0, 0, 1, 1], [], []>} : vector<16x256xbf16>, vector<256x256xbf16>, vector<16x256xf32> -> vector<16x256xf32>
    %c0_9 = arith.constant 0 : index
    %c0_10 = arith.constant 0 : index
    %12 = vector.load %arg5[%c0_9, %c0_10] : memref<1x256xf32, #tpu.memory_space<vmem>>, vector<1x256xf32>
    %13 = vector.broadcast %12 : vector<1x256xf32> to vector<16x256xf32>
    %14 = arith.addf %11, %13 : vector<16x256xf32>
    %15 = arith.truncf %14 : vector<16x256xf32> to vector<16x256xbf16>
    %c0_11 = arith.constant 0 : index
    %c0_12 = arith.constant 0 : index
    %16 = vector.load %arg6[%c0_11, %c0_12] : memref<16x256xbf16, #tpu.memory_space<vmem>>, vector<16x256xbf16>
    tpu.vector_store %arg6[%c0_11, %c0_12], %15 {strides = array<i32>} : memref<16x256xbf16, #tpu.memory_space<vmem>>, vector<16x256xbf16>,
    return
  }
  func.func @transform_0(%arg0: i32) -> (i32, i32) {
    %c0_i32 = arith.constant 0 : i32
    %c0_i32_0 = arith.constant 0 : i32
    return %arg0, %c0_i32 : i32, i32
  }
  func.func @transform_1(%arg0: i32) -> (i32, i32) {
    %c0_i32 = arith.constant 0 : i32
    %c0_i32_0 = arith.constant 0 : i32
    %c0_i32_1 = arith.constant 0 : i32
    return %c0_i32, %c0_i32_0 : i32, i32
  }
  func.func @transform_2(%arg0: i32) -> (i32, i32) {
    %c0_i32 = arith.constant 0 : i32
    %c0_i32_0 = arith.constant 0 : i32
    %c0_i32_1 = arith.constant 0 : i32
    return %c0_i32, %c0_i32_0 : i32, i32
  }
  func.func @transform_3(%arg0: i32) -> (i32, i32) {
    %c0_i32 = arith.constant 0 : i32
    %c0_i32_0 = arith.constant 0 : i32
    %c0_i32_1 = arith.constant 0 : i32
    return %c0_i32, %c0_i32_0 : i32, i32
  }
  func.func @transform_4(%arg0: i32) -> (i32, i32) {
    %c0_i32 = arith.constant 0 : i32
    %c0_i32_0 = arith.constant 0 : i32
    %c0_i32_1 = arith.constant 0 : i32
    return %c0_i32, %c0_i32_0 : i32, i32
  }
  func.func @transform_5(%arg0: i32) -> (i32, i32) {
    %c0_i32 = arith.constant 0 : i32
    %c0_i32_0 = arith.constant 0 : i32
    return %arg0, %c0_i32 : i32, i32
  }
}

module attributes {stable_mosaic.version = 11 : i64} {
  func.func @decoder_kernel(%arg0: i32, %arg1: memref<16x128xf32, #tpu.memory_space<vmem>>, %arg2: memref<128x256xbf16, #tpu.memory_space<vmem>>, %arg3: memref<1x256xf32, #tpu.memory_space<vmem>>, %arg4: memref<256x256xbf16, #tpu.memory_space<vmem>>, %arg5: memref<1x256xf32, #tpu.memory_space<vmem>>, %arg6: memref<16x256xbf16, #tpu.memory_space<vmem>>) attributes {dimension_semantics = [#tpu.dimension_semantics<parallel>], iteration_bounds = array<i64: 1>, scalar_prefetch = 0 : i64, scratch_operands = 0 : i64, tpu.core_type = #tpu.core_type<tc>, window_params = [{transform_indices = @transform_0, window_bounds = array<i64: 16, 128>}, {pipeline_mode = #tpu.pipeline_mode<synchronous>, transform_indices = @transform_1, window_bounds = array<i64: 128, 256>}, {pipeline_mode = #tpu.pipeline_mode<synchronous>, transform_indices = @transform_2, window_bounds = array<i64: 1, 256>}, {pipeline_mode = #tpu.pipeline_mode<synchronous>, transform_indices = @transform_3, window_bounds = array<i64: 256, 256>}, {pipeline_mode = #tpu.pipeline_mode<synchronous>, transform_indices = @transform_4, window_bounds = array<i64: 1, 256>}, {transform_indices = @transform_5, window_bounds = array<i64: 16, 256>}]} {
    %c0 = arith.constant 0 : index
    %c0_0 = arith.constant 0 : index
    %0 = vector.load %arg1[%c0, %c0_0] : memref<16x128xf32, #tpu.memory_space<vmem>>, vector<16x128xf32>
    %1 = arith.truncf %0 : vector<16x128xf32> to vector<16x128xbf16>
    %c0_1 = arith.constant 0 : index
    %c0_2 = arith.constant 0 : index
    %2 = vector.load %arg2[%c0_1, %c0_2] : memref<128x256xbf16, #tpu.memory_space<vmem>>, vector<128x256xbf16>
    %cst = arith.constant dense<0.000000e+00> : vector<16x256xf32>
    %3 = tpu.matmul %1, %2, %cst {dimension_numbers = #tpu.dot_dimension_numbers<[1], [0], [0], [1], [0, 0, 1, 1], [], []>} : vector<16x128xbf16>, vector<128x256xbf16>, vector<16x256xf32> -> vector<16x256xf32>
    %c0_3 = arith.constant 0 : index
    %c0_4 = arith.constant 0 : index
    %4 = vector.load %arg3[%c0_3, %c0_4] : memref<1x256xf32, #tpu.memory_space<vmem>>, vector<1x256xf32>
    %5 = vector.broadcast %4 : vector<1x256xf32> to vector<16x256xf32>
    %6 = arith.addf %3, %5 : vector<16x256xf32>
    %cst_5 = arith.constant 0.000000e+00 : f32
    %7 = vector.broadcast %cst_5 : f32 to vector<16x256xf32>
    %8 = arith.maximumf %6, %7 : vector<16x256xf32>
    %9 = arith.truncf %8 : vector<16x256xf32> to vector<16x256xbf16>
    %c0_6 = arith.constant 0 : index
    %c0_7 = arith.constant 0 : index
    %10 = vector.load %arg4[%c0_6, %c0_7] : memref<256x256xbf16, #tpu.memory_space<vmem>>, vector<256x256xbf16>
    %cst_8 = arith.constant dense<0.000000e+00> : vector<16x256xf32>
    %11 = tpu.matmul %9, %10, %cst_8 {dimension_numbers = #tpu.dot_dimension_numbers<[1], [0], [0], [1], [0, 0, 1, 1], [], []>} : vector<16x256xbf16>, vector<256x256xbf16>, vector<16x256xf32> -> vector<16x256xf32>
    %c0_9 = arith.constant 0 : index
    %c0_10 = arith.constant 0 : index
    %12 = vector.load %arg5[%c0_9, %c0_10] : memref<1x256xf32, #tpu.memory_space<vmem>>, vector<1x256xf32>
    %13 = vector.broadcast %12 : vector<1x256xf32> to vector<16x256xf32>
    %14 = arith.addf %11, %13 : vector<16x256xf32>
    %15 = arith.truncf %14 : vector<16x256xf32> to vector<16x256xbf16>
    %c0_11 = arith.constant 0 : index
    %c0_12 = arith.constant 0 : index
    %16 = vector.load %arg6[%c0_11, %c0_12] : memref<16x256xbf16, #tpu.memory_space<vmem>>, vector<16x256xbf16>
    tpu.vector_store %arg6[%c0_11, %c0_12], %15 {strides = array<i32>} : memref<16x256xbf16, #tpu.memory_space<vmem>>, vector<16x256xbf16>,
    return
  }
  func.func @transform_0(%arg0: i32) -> (i32, i32) {
    %c0_i32 = arith.constant 0 : i32
    %c0_i32_0 = arith.constant 0 : i32
    return %arg0, %c0_i32 : i32, i32
  }
  func.func @transform_1(%arg0: i32) -> (i32, i32) {
    %c0_i32 = arith.constant 0 : i32
    %c0_i32_0 = arith.constant 0 : i32
    %c0_i32_1 = arith.constant 0 : i32
    return %c0_i32, %c0_i32_0 : i32, i32
  }
  func.func @transform_2(%arg0: i32) -> (i32, i32) {
    %c0_i32 = arith.constant 0 : i32
    %c0_i32_0 = arith.constant 0 : i32
    %c0_i32_1 = arith.constant 0 : i32
    return %c0_i32, %c0_i32_0 : i32, i32
  }
  func.func @transform_3(%arg0: i32) -> (i32, i32) {
    %c0_i32 = arith.constant 0 : i32
    %c0_i32_0 = arith.constant 0 : i32
    %c0_i32_1 = arith.constant 0 : i32
    return %c0_i32, %c0_i32_0 : i32, i32
  }
  func.func @transform_4(%arg0: i32) -> (i32, i32) {
    %c0_i32 = arith.constant 0 : i32
    %c0_i32_0 = arith.constant 0 : i32
    %c0_i32_1 = arith.constant 0 : i32
    return %c0_i32, %c0_i32_0 : i32, i32
  }
  func.func @transform_5(%arg0: i32) -> (i32, i32) {
    %c0_i32 = arith.constant 0 : i32
    %c0_i32_0 = arith.constant 0 : i32
    return %arg0, %c0_i32 : i32, i32
  }
}

</mosaic_0001>

<bundles_post_ra>
// kernel: tpu_custom_call.1
= control target key start
LH: loop header
LB: loop body
LE: loop exit
PB: predicated region body
PF: predicated region fallthrough
CT: control target
= control target key end

     0   :  { %10 = vsyncpa [#allocation3], 0  ;;  %s837_s0 = inlined_call_operand.hbm [shape: f32[16,128], index: 0, kind: input, shape index: {}]   ;;  %s838_s1 = inlined_call_operand.hbm [shape: bf16[128,256], index: 1, kind: input, shape index: {}]   ;;  %s839_s2 = inlined_call_operand.vmem [shape: f32[1,256], index: 2, kind: input, shape index: {}]   ;;  %s840_s3 = inlined_call_operand.hbm [shape: bf16[256,256], index: 3, kind: input, shape index: {}]   ;;  %s841_s4 = inlined_call_operand.vmem [shape: f32[1,256], index: 4, kind: input, shape index: {}]   ;;  %s842_s5 = inlined_call_operand.hbm [shape: bf16[16,256], index: 5, kind: output, shape index: {}]  }
   0x1   :  { %11 = vsyncpa [#allocation6], 0 }
   0x2   :  { %12 = vsyncpa [#allocation4], 0  ;;  %s727_s18 = smov [#allocation5]   ;;  %s728_s20 = smov [#allocation2]  }
   0x3   :  { %s30_s19 = sshll.u32 %s727_s18, 4  ;;  %s18_s21 = sshll.u32 %s728_s20, 4  ;;  %s31_s19 = int_to_ptr.vmem [resolvable:$true] %s30_s19  ;;  %s764_s21 = int_to_ptr.vmem [resolvable:$true] %s18_s21 }
   0x4   :  { %s633_s24 = scalar_lea.hbm %s838_s1, 2048 }
   0x5   :  { %p634_p0 = scmp.ne.s32.totalorder %s838_s1, %s633_s24  ;;  %p637_p1 = scmp.lt.u32.totalorder %s633_s24, %s838_s1 }
   0x7   :  { %p639_p2 = pnand %p637_p1, %p634_p0 }
   0x9   :  { %642 = shalt.err (!%p639_p2)
}
   0xa   :  { %s643_s29 = scalar_lea.vmem %s31_s19, 2048  ;;  %p648_p4 = scmp.lt.s32.totalorder %s31_s19, %s31_s19 }
   0xb   :  { %p644_p3 = scmp.ne.s32.totalorder %s31_s19, %s643_s29  ;;  %p649_p5 = scmp.lt.s32.totalorder %s643_s29, %s643_s29 }
   0xd   :  { %p650_p6 = por %p649_p5, %p648_p4 }
   0xf   :  { %p651_p7 = pnand %p650_p6, %p644_p3 }
  0x11   :  { %654 = shalt.err (!%p651_p7)
}
  0x12   :  { %s729_s30 = smov 128   ;;  %s730_s6 = smov 8  }
  0x13   :  { %36 = dma.hbm_to_vmem [thread:$0]  %s838_s1, 2048, %s31_s19, [#allocation6], %s729_s30, %s729_s30, %s730_s6  }
  0x14   :  { %s655_s11 = scalar_lea.hbm %s837_s0, 256 }
  0x15   :  { %p656_p8 = scmp.ne.s32.totalorder %s837_s0, %s655_s11  ;;  %p659_p9 = scmp.lt.u32.totalorder %s655_s11, %s837_s0 }
  0x17   :  { %p661_p10 = pnand %p659_p9, %p656_p8 }
  0x19   :  { %664 = shalt.err (!%p661_p10)
}
  0x1a   :  { %s665_s16 = scalar_lea.vmem %s764_s21, 256  ;;  %p670_p12 = scmp.lt.s32.totalorder %s764_s21, %s764_s21 }
  0x1b   :  { %p666_p11 = scmp.ne.s32.totalorder %s764_s21, %s665_s16  ;;  %p671_p13 = scmp.lt.s32.totalorder %s665_s16, %s665_s16 }
  0x1d   :  { %p672_p0 = por %p671_p13, %p670_p12 }
  0x1f   :  { %p673_p1 = pnand %p672_p0, %p666_p11 }
  0x21   :  { %676 = shalt.err (!%p673_p1)
}
  0x22   :  { %24 = dma.hbm_to_vmem [thread:$0]  %s837_s0, 256, %s764_s21, [#allocation3], %s729_s30, %s729_s30, %s730_s6  }
  0x23   :  { %s731_s18 = smov [#allocation7]   ;;  %s677_s23 = scalar_lea.hbm %s840_s3, 4096 }
  0x24   :  { %s44_s19 = sshll.u32 %s731_s18, 4  ;;  %p678_p2 = scmp.ne.s32.totalorder %s840_s3, %s677_s23  ;;  %s45_s19 = int_to_ptr.vmem [resolvable:$true] %s44_s19 }
  0x25   :  { %p681_p3 = scmp.lt.u32.totalorder %s677_s23, %s840_s3 }
  0x27   :  { %p683_p4 = pnand %p681_p3, %p678_p2 }
  0x29   :  { %686 = shalt.err (!%p683_p4)
}
  0x2a   :  { %s687_s28 = scalar_lea.vmem %s45_s19, 4096  ;;  %p692_p6 = scmp.lt.s32.totalorder %s45_s19, %s45_s19 }
  0x2b   :  { %p688_p5 = scmp.ne.s32.totalorder %s45_s19, %s687_s28  ;;  %p693_p7 = scmp.lt.s32.totalorder %s687_s28, %s687_s28 }
  0x2d   :  { %p694_p8 = por %p693_p7, %p692_p6 }
  0x2f   :  { %p695_p9 = pnand %p694_p8, %p688_p5 }
  0x31   :  { %698 = shalt.err (!%p695_p9)
}
  0x32   :  { %50 = dma.hbm_to_vmem [thread:$0]  %s840_s3, 4096, %s45_s19, [#allocation6], %s729_s30, %s729_s30, %s730_s6  }
  0x33   :  { %721 = dma.done.wait [#allocation3], 256  }
  0x34   :  { %722 = vsyncadd [#allocation3], 4294967040 }
  0x35   :  { %723 = dma.done.wait [#allocation6], 6144  }
  0x36   :  { %724 = vsyncadd [#allocation6], 4294961152  ;;  %v732_v0 = vmov 0   ;;  %v561_v1 = vld [vmem:[#allocation5 + $0x4] ss:$8 sps:$4 sm:$0xff]   ;;  %v63_v26 = vld [vmem:[#allocation2] sm:$0xff]  ;;  %v84_v52 = vlaneseq }
  0x37   :  { %206 = vmatprep.mubr.bf16.mxu0 %v732_v0  ;;  %v563_v2 = vld [vmem:[#allocation5] ss:$8 sps:$4 sm:$0xff]   ;;  %174 = vmatprep.subr.bf16.mxu0 %v561_v1  ;;  %v564_v3 = vld [vmem:[#allocation5 + $0x14] ss:$8 sps:$4 sm:$0xff]   ;;  %v566_v4 = vld [vmem:[#allocation5 + $0x10] ss:$8 sps:$4 sm:$0xff]  }
  0x38   :  { %175 = vmatpush1.bf16.msra.mxu0 %v563_v2  ;;  %v567_v5 = vld [vmem:[#allocation5 + $0x24] ss:$8 sps:$4 sm:$0xff]   ;;  %v569_v6 = vld [vmem:[#allocation5 + $0x20] ss:$8 sps:$4 sm:$0xff]   ;;  %v570_v7 = vld [vmem:[#allocation5 + $0x34] ss:$8 sps:$4 sm:$0xff]  }
  0x39   :  { %176 = vmatprep.subr.bf16.mxu0 %v564_v3  ;;  %v572_v8 = vld [vmem:[#allocation5 + $0x30] ss:$8 sps:$4 sm:$0xff]   ;;  %v573_v9 = vld [vmem:[#allocation5 + $0x44] ss:$8 sps:$4 sm:$0xff]   ;;  %v587_v11 = vld [vmem:[#allocation7] ss:$8 sps:$4 sm:$0xff]  }
  0x3a   :  { %v585_v10 = vld [vmem:[#allocation7 + $0x4] ss:$8 sps:$4 sm:$0xff]   ;;  %v588_v12 = vld [vmem:[#allocation7 + $0x14] ss:$8 sps:$4 sm:$0xff]   ;;  %v575_v13 = vld [vmem:[#allocation5 + $0x40] ss:$8 sps:$4 sm:$0xff]  }
  0x3b   :  { %427 = vmatprep.subr.bf16.mxu1 %v585_v10  ;;  %v590_v14 = vld [vmem:[#allocation7 + $0x10] ss:$8 sps:$4 sm:$0xff]   ;;  %v576_v15 = vld [vmem:[#allocation5 + $0x54] ss:$8 sps:$4 sm:$0xff]   ;;  %v591_v16 = vld [vmem:[#allocation7 + $0x24] ss:$8 sps:$4 sm:$0xff]  }
  0x3c   :  { %177 = vmatpush1.bf16.msra.mxu0 %v566_v4  ;;  %428 = vmatpush1.bf16.msra.mxu1 %v587_v11  ;;  %v578_v17 = vld [vmem:[#allocation5 + $0x50] ss:$8 sps:$4 sm:$0xff]   ;;  %v593_v18 = vld [vmem:[#allocation7 + $0x20] ss:$8 sps:$4 sm:$0xff]   ;;  %v579_v19 = vld [vmem:[#allocation5 + $0x64] ss:$8 sps:$4 sm:$0xff]  }
  0x3d   :  { %178 = vmatprep.subr.bf16.mxu0 %v567_v5  ;;  %429 = vmatprep.subr.bf16.mxu1 %v588_v12  ;;  %v594_v20 = vld [vmem:[#allocation7 + $0x34] ss:$8 sps:$4 sm:$0xff]   ;;  %v581_v21 = vld [vmem:[#allocation5 + $0x60] ss:$8 sps:$4 sm:$0xff]   ;;  %v596_v22 = vld [vmem:[#allocation7 + $0x30] ss:$8 sps:$4 sm:$0xff]  }
  0x3e   :  { %v582_v23 = vld [vmem:[#allocation5 + $0x74] ss:$8 sps:$4 sm:$0xff]   ;;  %v597_v24 = vld [vmem:[#allocation7 + $0x44] ss:$8 sps:$4 sm:$0xff]   ;;  %v584_v25 = vld [vmem:[#allocation5 + $0x70] ss:$8 sps:$4 sm:$0xff]  }
  0x3f   :  { %v64_v27 = vld [vmem:[#allocation2 + $0x8] sm:$0xff]  ;;  %v599_v28 = vld [vmem:[#allocation7 + $0x40] ss:$8 sps:$4 sm:$0xff]   ;;  %v603_v32 = vld [vmem:[#allocation7 + $0x64] ss:$8 sps:$4 sm:$0xff]   ;;  %v85_v53 = vshrl.u32 %v84_v52, 7 }
  0x40   :  { %179 = vmatpush1.bf16.msra.mxu0 %v569_v6  ;;  %430 = vmatpush1.bf16.msra.mxu1 %v590_v14  ;;  %v600_v29 = vld [vmem:[#allocation7 + $0x54] ss:$8 sps:$4 sm:$0xff]   ;;  %v65_v30 = vpack.c.bf16 %v64_v27, %v63_v26  ;;  %v602_v31 = vld [vmem:[#allocation7 + $0x50] ss:$8 sps:$4 sm:$0xff]   ;;  %v605_v33 = vld [vmem:[#allocation7 + $0x60] ss:$8 sps:$4 sm:$0xff]  }
  0x41   :  { %180 = vmatprep.subr.bf16.mxu0 %v570_v7  ;;  %431 = vmatprep.subr.bf16.mxu1 %v591_v16  ;;  %v606_v34 = vld [vmem:[#allocation7 + $0x74] ss:$8 sps:$4 sm:$0xff]   ;;  %v608_v35 = vld [vmem:[#allocation7 + $0x70] ss:$8 sps:$4 sm:$0xff]   ;;  %v609_v36 = vld [vmem:[#allocation7 + $0x84] ss:$8 sps:$4 sm:$0xff]  }
  0x42   :  { %v611_v37 = vld [vmem:[#allocation7 + $0x80] ss:$8 sps:$4 sm:$0xff]   ;;  %v612_v38 = vld [vmem:[#allocation7 + $0x94] ss:$8 sps:$4 sm:$0xff]   ;;  %v614_v39 = vld [vmem:[#allocation7 + $0x90] ss:$8 sps:$4 sm:$0xff]  }
  0x43   :  { %v615_v40 = vld [vmem:[#allocation7 + $0xa4] ss:$8 sps:$4 sm:$0xff]   ;;  %v617_v41 = vld [vmem:[#allocation7 + $0xa0] ss:$8 sps:$4 sm:$0xff]   ;;  %v618_v42 = vld [vmem:[#allocation7 + $0xb4] ss:$8 sps:$4 sm:$0xff]  }
  0x44   :  { %181 = vmatpush1.bf16.msra.mxu0 %v572_v8  ;;  %432 = vmatpush1.bf16.msra.mxu1 %v593_v18  ;;  %v620_v43 = vld [vmem:[#allocation7 + $0xb0] ss:$8 sps:$4 sm:$0xff]   ;;  %v621_v44 = vld [vmem:[#allocation7 + $0xc4] ss:$8 sps:$4 sm:$0xff]   ;;  %v623_v45 = vld [vmem:[#allocation7 + $0xc0] ss:$8 sps:$4 sm:$0xff]  }
  0x45   :  { %182 = vmatprep.subr.bf16.mxu0 %v573_v9  ;;  %433 = vmatprep.subr.bf16.mxu1 %v594_v20  ;;  %v624_v46 = vld [vmem:[#allocation7 + $0xd4] ss:$8 sps:$4 sm:$0xff]   ;;  %v626_v47 = vld [vmem:[#allocation7 + $0xd0] ss:$8 sps:$4 sm:$0xff]   ;;  %v627_v48 = vld [vmem:[#allocation7 + $0xe4] ss:$8 sps:$4 sm:$0xff]  }
  0x46   :  { %v629_v49 = vld [vmem:[#allocation7 + $0xe0] ss:$8 sps:$4 sm:$0xff]   ;;  %v630_v50 = vld [vmem:[#allocation7 + $0xf4] ss:$8 sps:$4 sm:$0xff]   ;;  %v632_v51 = vld [vmem:[#allocation7 + $0xf0] ss:$8 sps:$4 sm:$0xff]  }
  0x47   :  { %v86_v54 = vsub.s32 0, %v85_v53  ;;  %v82_v55 = vld [vmem:[%s839_s2] sm:$0x3]  ;;  %v90_v56 = vsub.s32 1, %v85_v53  ;;  %s733_s8 = smov [#allocation8]  }
  0x48   :  { %183 = vmatpush1.bf16.msra.mxu0 %v575_v13  ;;  %434 = vmatpush1.bf16.msra.mxu1 %v596_v22  ;;  %v255_v9 = vld [vmem:[%s841_s4] sm:$0x3]  ;;  %s489_s9 = sshll.u32 %s733_s8, 4  ;;  %s490_s9 = int_to_ptr.vmem [resolvable:$true] %s489_s9 }
  0x49   :  { %184 = vmatprep.subr.bf16.mxu0 %v576_v15  ;;  %435 = vmatprep.subr.bf16.mxu1 %v597_v24  ;;  %v87_v57 = vrot.slane %v82_v55, %v86_v54  ;;  %v91_v58 = vrot.slane %v82_v55, %v90_v56  ;;  %v260_v10 = vrot.slane %v255_v9, %v86_v54  ;;  %s699_s10 = scalar_lea.vmem %s490_s9, 256  ;;  %p704_p11 = scmp.lt.s32.totalorder %s490_s9, %s490_s9 }
  0x4a   :  { %v264_v11 = vrot.slane %v255_v9, %v90_v56  ;;  %p700_p10 = scmp.ne.s32.totalorder %s490_s9, %s699_s10  ;;  %p705_p12 = scmp.lt.s32.totalorder %s699_s10, %s699_s10 }
  0x4c   :  { %185 = vmatpush1.bf16.msra.mxu0 %v578_v17  ;;  %436 = vmatpush1.bf16.msra.mxu1 %v599_v28  ;;  %p706_p13 = por %p705_p12, %p704_p11 }
  0x4d   :  { %186 = vmatprep.subr.bf16.mxu0 %v579_v19  ;;  %437 = vmatprep.subr.bf16.mxu1 %v600_v29 }
  0x4e   :  { %p707_p0 = pnand %p706_p13, %p700_p10 }
  0x50   :  { %187 = vmatpush1.bf16.msra.mxu0 %v581_v21  ;;  %438 = vmatpush1.bf16.msra.mxu1 %v602_v31 }
  0x51   :  { %188 = vmatprep.subr.bf16.mxu0 %v582_v23  ;;  %439 = vmatprep.subr.bf16.mxu1 %v603_v32 }
  0x54   :  { %189 = vmatpush1.bf16.msra.mxu0 %v584_v25  ;;  %440 = vmatpush1.bf16.msra.mxu1 %v605_v33 }
  0x55   :  { %441 = vmatprep.subr.bf16.mxu1 %v606_v34 }
  0x57   :  { %207 = vmatmul.mubr.bf16.vlgmr.msra.gmra.mrb[0].mxu0 %v65_v30 }
  0x58   :  { %442 = vmatpush1.bf16.msra.mxu1 %v608_v35 }
  0x59   :  { %443 = vmatprep.subr.bf16.mxu1 %v609_v36 }
  0x5c   :  { %444 = vmatpush1.bf16.msra.mxu1 %v611_v37 }
  0x5d   :  { %445 = vmatprep.subr.bf16.mxu1 %v612_v38 }
  0x60   :  { %446 = vmatpush1.bf16.msra.mxu1 %v614_v39 }
  0x61   :  { %447 = vmatprep.subr.bf16.mxu1 %v615_v40 }
  0x64   :  { %448 = vmatpush1.bf16.msra.mxu1 %v617_v41 }
  0x65   :  { %449 = vmatprep.subr.bf16.mxu1 %v618_v42 }
  0x68   :  { %450 = vmatpush1.bf16.msra.mxu1 %v620_v43 }
  0x69   :  { %451 = vmatprep.subr.bf16.mxu1 %v621_v44 }
  0x6c   :  { %452 = vmatpush1.bf16.msra.mxu1 %v623_v45 }
  0x6d   :  { %453 = vmatprep.subr.bf16.mxu1 %v624_v46 }
  0x70   :  { %454 = vmatpush1.bf16.msra.mxu1 %v626_v47 }
  0x71   :  { %455 = vmatprep.subr.bf16.mxu1 %v627_v48 }
  0x74   :  { %456 = vmatpush1.bf16.msra.mxu1 %v629_v49 }
  0x75   :  { %457 = vmatprep.subr.bf16.mxu1 %v630_v50 }
  0x78   :  { %458 = vmatpush1.bf16.msra.mxu1 %v632_v51 }
 0x12a   :  { %v208_v59 = vpop.f32.mrb[0].mxu0 }
 0x12b   :  { %v209_v60 = vadd.f32 %v208_v59, %v87_v57  ;;  %v210_v61 = vpop.f32.mrb[1].mxu0 }
 0x12c   :  { %v211_v62 = vadd.f32 %v210_v61, %v91_v58  ;;  %v212_v63 = vpop.f32.mrb[2].mxu0 }
 0x12d   :  { %v213_v0 = vadd.f32 %v212_v63, %v87_v57  ;;  %v214_v1 = vpop.f32.mrb[3].mxu0  ;;  %v217_v3 = vmax.f32 %v209_v60, 0.0 }
 0x12e   :  { %v215_v2 = vadd.f32 %v214_v1, %v91_v58  ;;  %v218_v5 = vmax.f32 %v211_v62, 0.0 }
 0x12f   :  { %v219_v4 = vmax.f32 %v213_v0, 0.0 }
 0x130   :  { %v220_v6 = vmax.f32 %v215_v2, 0.0 }
 0x131   :  { %v221_v7 = vpack.c.bf16 %v219_v4, %v217_v3 }
 0x132   :  { %v222_v8 = vpack.c.bf16 %v220_v6, %v218_v5 }
 0x134   :  { %459 = vmatprep.mubr.bf16.mxu1 %v222_v8 }
 0x135   :  { %460 = vmatmul.mubr.bf16.vlgmr.msra.gmra.mrb[0].mxu1 %v221_v7 }
 0x208   :  { %v461_v12 = vpop.f32.mrb[0].mxu1 }
 0x209   :  { %v462_v13 = vadd.f32 %v461_v12, %v260_v10  ;;  %v463_v14 = vpop.f32.mrb[1].mxu1 }
 0x20a   :  { %v464_v15 = vadd.f32 %v463_v14, %v264_v11  ;;  %v465_v16 = vpop.f32.mrb[2].mxu1 }
 0x20b   :  { %v466_v17 = vadd.f32 %v465_v16, %v260_v10  ;;  %v467_v18 = vpop.f32.mrb[3].mxu1 }
 0x20c   :  { %v552_v19 = vpack.c.bf16 %v464_v15, %v462_v13  ;;  %v468_v20 = vadd.f32 %v467_v18, %v264_v11 }
 0x20e   :  { %482 = vst [vmem:[#allocation8] sm:$0xff] %v552_v19  ;;  %v553_v21 = vpack.c.bf16 %v468_v20, %v466_v17 }
 0x210   :  { %483 = vst [vmem:[#allocation8 + $0x8] sm:$0xff] %v553_v21 }
 0x211   :  { %710 = shalt.err (!%p707_p0)
}
 0x212   :  { %s711_s12 = scalar_lea.hbm %s842_s5, 256 }
 0x213   :  { %p712_p1 = scmp.ne.s32.totalorder %s842_s5, %s711_s12  ;;  %p715_p2 = scmp.lt.u32.totalorder %s711_s12, %s842_s5 }
 0x215   :  { %p717_p3 = pnand %p715_p2, %p712_p1 }
 0x217   :  { %720 = shalt.err (!%p717_p3)
}
 0x218   :  { %495 = dma.vmem_to_hbm [thread:$0]  %s490_s9, 256, %s842_s5, [#allocation4], %s729_s30, %s729_s30, %s730_s6  }
 0x219   :  { %725 = dma.done.wait [#allocation4], 256  }
 0x21a   :  { %726 = vsyncadd [#allocation4], 4294967040 }
 0x21b   :  { %499 = vsyncpa [#allocation3], 1 }
 0x21c   :  { %500 = vsyncpa [#allocation6], 1 }
 0x21d   :  { %501 = vsyncpa [#allocation4], 1 }

// kernel: tpu_custom_call.1
= control target key start
LH: loop header
LB: loop body
LE: loop exit
PB: predicated region body
PF: predicated region fallthrough
CT: control target
= control target key end

     0   :  { %10 = vsyncpa [#allocation3], 0  ;;  %s837_s0 = inlined_call_operand.hbm [shape: f32[16,128], index: 0, kind: input, shape index: {}]   ;;  %s838_s1 = inlined_call_operand.hbm [shape: bf16[128,256], index: 1, kind: input, shape index: {}]   ;;  %s839_s2 = inlined_call_operand.vmem [shape: f32[1,256], index: 2, kind: input, shape index: {}]   ;;  %s840_s3 = inlined_call_operand.hbm [shape: bf16[256,256], index: 3, kind: input, shape index: {}]   ;;  %s841_s4 = inlined_call_operand.vmem [shape: f32[1,256], index: 4, kind: input, shape index: {}]   ;;  %s842_s5 = inlined_call_operand.hbm [shape: bf16[16,256], index: 5, kind: output, shape index: {}]  }
   0x1   :  { %11 = vsyncpa [#allocation6], 0 }
   0x2   :  { %12 = vsyncpa [#allocation4], 0  ;;  %s727_s18 = smov [#allocation5]   ;;  %s728_s20 = smov [#allocation2]  }
   0x3   :  { %s30_s19 = sshll.u32 %s727_s18, 4  ;;  %s18_s21 = sshll.u32 %s728_s20, 4  ;;  %s31_s19 = int_to_ptr.vmem [resolvable:$true] %s30_s19  ;;  %s764_s21 = int_to_ptr.vmem [resolvable:$true] %s18_s21 }
   0x4   :  { %s633_s24 = scalar_lea.hbm %s838_s1, 2048 }
   0x5   :  { %p634_p0 = scmp.ne.s32.totalorder %s838_s1, %s633_s24  ;;  %p637_p1 = scmp.lt.u32.totalorder %s633_s24, %s838_s1 }
   0x7   :  { %p639_p2 = pnand %p637_p1, %p634_p0 }
   0x9   :  { %642 = shalt.err (!%p639_p2)
}
   0xa   :  { %s643_s29 = scalar_lea.vmem %s31_s19, 2048  ;;  %p648_p4 = scmp.lt.s32.totalorder %s31_s19, %s31_s19 }
   0xb   :  { %p644_p3 = scmp.ne.s32.totalorder %s31_s19, %s643_s29  ;;  %p649_p5 = scmp.lt.s32.totalorder %s643_s29, %s643_s29 }
   0xd   :  { %p650_p6 = por %p649_p5, %p648_p4 }
   0xf   :  { %p651_p7 = pnand %p650_p6, %p644_p3 }
  0x11   :  { %654 = shalt.err (!%p651_p7)
}
  0x12   :  { %s729_s30 = smov 128   ;;  %s730_s6 = smov 8  }
  0x13   :  { %36 = dma.hbm_to_vmem [thread:$0]  %s838_s1, 2048, %s31_s19, [#allocation6], %s729_s30, %s729_s30, %s730_s6  }
  0x14   :  { %s655_s11 = scalar_lea.hbm %s837_s0, 256 }
  0x15   :  { %p656_p8 = scmp.ne.s32.totalorder %s837_s0, %s655_s11  ;;  %p659_p9 = scmp.lt.u32.totalorder %s655_s11, %s837_s0 }
  0x17   :  { %p661_p10 = pnand %p659_p9, %p656_p8 }
  0x19   :  { %664 = shalt.err (!%p661_p10)
}
  0x1a   :  { %s665_s16 = scalar_lea.vmem %s764_s21, 256  ;;  %p670_p12 = scmp.lt.s32.totalorder %s764_s21, %s764_s21 }
  0x1b   :  { %p666_p11 = scmp.ne.s32.totalorder %s764_s21, %s665_s16  ;;  %p671_p13 = scmp.lt.s32.totalorder %s665_s16, %s665_s16 }
  0x1d   :  { %p672_p0 = por %p671_p13, %p670_p12 }
  0x1f   :  { %p673_p1 = pnand %p672_p0, %p666_p11 }
  0x21   :  { %676 = shalt.err (!%p673_p1)
}
  0x22   :  { %24 = dma.hbm_to_vmem [thread:$0]  %s837_s0, 256, %s764_s21, [#allocation3], %s729_s30, %s729_s30, %s730_s6  }
  0x23   :  { %s731_s18 = smov [#allocation7]   ;;  %s677_s23 = scalar_lea.hbm %s840_s3, 4096 }
  0x24   :  { %s44_s19 = sshll.u32 %s731_s18, 4  ;;  %p678_p2 = scmp.ne.s32.totalorder %s840_s3, %s677_s23  ;;  %s45_s19 = int_to_ptr.vmem [resolvable:$true] %s44_s19 }
  0x25   :  { %p681_p3 = scmp.lt.u32.totalorder %s677_s23, %s840_s3 }
  0x27   :  { %p683_p4 = pnand %p681_p3, %p678_p2 }
  0x29   :  { %686 = shalt.err (!%p683_p4)
}
  0x2a   :  { %s687_s28 = scalar_lea.vmem %s45_s19, 4096  ;;  %p692_p6 = scmp.lt.s32.totalorder %s45_s19, %s45_s19 }
  0x2b   :  { %p688_p5 = scmp.ne.s32.totalorder %s45_s19, %s687_s28  ;;  %p693_p7 = scmp.lt.s32.totalorder %s687_s28, %s687_s28 }
  0x2d   :  { %p694_p8 = por %p693_p7, %p692_p6 }
  0x2f   :  { %p695_p9 = pnand %p694_p8, %p688_p5 }
  0x31   :  { %698 = shalt.err (!%p695_p9)
}
  0x32   :  { %50 = dma.hbm_to_vmem [thread:$0]  %s840_s3, 4096, %s45_s19, [#allocation6], %s729_s30, %s729_s30, %s730_s6  }
  0x33   :  { %721 = dma.done.wait [#allocation3], 256  }
  0x34   :  { %722 = vsyncadd [#allocation3], 4294967040 }
  0x35   :  { %723 = dma.done.wait [#allocation6], 6144  }
  0x36   :  { %724 = vsyncadd [#allocation6], 4294961152  ;;  %v732_v0 = vmov 0   ;;  %v561_v1 = vld [vmem:[#allocation5 + $0x4] ss:$8 sps:$4 sm:$0xff]   ;;  %v63_v26 = vld [vmem:[#allocation2] sm:$0xff]  ;;  %v84_v52 = vlaneseq }
  0x37   :  { %206 = vmatprep.mubr.bf16.mxu0 %v732_v0  ;;  %v563_v2 = vld [vmem:[#allocation5] ss:$8 sps:$4 sm:$0xff]   ;;  %174 = vmatprep.subr.bf16.mxu0 %v561_v1  ;;  %v564_v3 = vld [vmem:[#allocation5 + $0x14] ss:$8 sps:$4 sm:$0xff]   ;;  %v566_v4 = vld [vmem:[#allocation5 + $0x10] ss:$8 sps:$4 sm:$0xff]  }
  0x38   :  { %175 = vmatpush1.bf16.msra.mxu0 %v563_v2  ;;  %v567_v5 = vld [vmem:[#allocation5 + $0x24] ss:$8 sps:$4 sm:$0xff]   ;;  %v569_v6 = vld [vmem:[#allocation5 + $0x20] ss:$8 sps:$4 sm:$0xff]   ;;  %v570_v7 = vld [vmem:[#allocation5 + $0x34] ss:$8 sps:$4 sm:$0xff]  }
  0x39   :  { %176 = vmatprep.subr.bf16.mxu0 %v564_v3  ;;  %v572_v8 = vld [vmem:[#allocation5 + $0x30] ss:$8 sps:$4 sm:$0xff]   ;;  %v573_v9 = vld [vmem:[#allocation5 + $0x44] ss:$8 sps:$4 sm:$0xff]   ;;  %v587_v11 = vld [vmem:[#allocation7] ss:$8 sps:$4 sm:$0xff]  }
  0x3a   :  { %v585_v10 = vld [vmem:[#allocation7 + $0x4] ss:$8 sps:$4 sm:$0xff]   ;;  %v588_v12 = vld [vmem:[#allocation7 + $0x14] ss:$8 sps:$4 sm:$0xff]   ;;  %v575_v13 = vld [vmem:[#allocation5 + $0x40] ss:$8 sps:$4 sm:$0xff]  }
  0x3b   :  { %427 = vmatprep.subr.bf16.mxu1 %v585_v10  ;;  %v590_v14 = vld [vmem:[#allocation7 + $0x10] ss:$8 sps:$4 sm:$0xff]   ;;  %v576_v15 = vld [vmem:[#allocation5 + $0x54] ss:$8 sps:$4 sm:$0xff]   ;;  %v591_v16 = vld [vmem:[#allocation7 + $0x24] ss:$8 sps:$4 sm:$0xff]  }
  0x3c   :  { %177 = vmatpush1.bf16.msra.mxu0 %v566_v4  ;;  %428 = vmatpush1.bf16.msra.mxu1 %v587_v11  ;;  %v578_v17 = vld [vmem:[#allocation5 + $0x50] ss:$8 sps:$4 sm:$0xff]   ;;  %v593_v18 = vld [vmem:[#allocation7 + $0x20] ss:$8 sps:$4 sm:$0xff]   ;;  %v579_v19 = vld [vmem:[#allocation5 + $0x64] ss:$8 sps:$4 sm:$0xff]  }
  0x3d   :  { %178 = vmatprep.subr.bf16.mxu0 %v567_v5  ;;  %429 = vmatprep.subr.bf16.mxu1 %v588_v12  ;;  %v594_v20 = vld [vmem:[#allocation7 + $0x34] ss:$8 sps:$4 sm:$0xff]   ;;  %v581_v21 = vld [vmem:[#allocation5 + $0x60] ss:$8 sps:$4 sm:$0xff]   ;;  %v596_v22 = vld [vmem:[#allocation7 + $0x30] ss:$8 sps:$4 sm:$0xff]  }
  0x3e   :  { %v582_v23 = vld [vmem:[#allocation5 + $0x74] ss:$8 sps:$4 sm:$0xff]   ;;  %v597_v24 = vld [vmem:[#allocation7 + $0x44] ss:$8 sps:$4 sm:$0xff]   ;;  %v584_v25 = vld [vmem:[#allocation5 + $0x70] ss:$8 sps:$4 sm:$0xff]  }
  0x3f   :  { %v64_v27 = vld [vmem:[#allocation2 + $0x8] sm:$0xff]  ;;  %v599_v28 = vld [vmem:[#allocation7 + $0x40] ss:$8 sps:$4 sm:$0xff]   ;;  %v603_v32 = vld [vmem:[#allocation7 + $0x64] ss:$8 sps:$4 sm:$0xff]   ;;  %v85_v53 = vshrl.u32 %v84_v52, 7 }
  0x40   :  { %179 = vmatpush1.bf16.msra.mxu0 %v569_v6  ;;  %430 = vmatpush1.bf16.msra.mxu1 %v590_v14  ;;  %v600_v29 = vld [vmem:[#allocation7 + $0x54] ss:$8 sps:$4 sm:$0xff]   ;;  %v65_v30 = vpack.c.bf16 %v64_v27, %v63_v26  ;;  %v602_v31 = vld [vmem:[#allocation7 + $0x50] ss:$8 sps:$4 sm:$0xff]   ;;  %v605_v33 = vld [vmem:[#allocation7 + $0x60] ss:$8 sps:$4 sm:$0xff]  }
  0x41   :  { %180 = vmatprep.subr.bf16.mxu0 %v570_v7  ;;  %431 = vmatprep.subr.bf16.mxu1 %v591_v16  ;;  %v606_v34 = vld [vmem:[#allocation7 + $0x74] ss:$8 sps:$4 sm:$0xff]   ;;  %v608_v35 = vld [vmem:[#allocation7 + $0x70] ss:$8 sps:$4 sm:$0xff]   ;;  %v609_v36 = vld [vmem:[#allocation7 + $0x84] ss:$8 sps:$4 sm:$0xff]  }
  0x42   :  { %v611_v37 = vld [vmem:[#allocation7 + $0x80] ss:$8 sps:$4 sm:$0xff]   ;;  %v612_v38 = vld [vmem:[#allocation7 + $0x94] ss:$8 sps:$4 sm:$0xff]   ;;  %v614_v39 = vld [vmem:[#allocation7 + $0x90] ss:$8 sps:$4 sm:$0xff]  }
  0x43   :  { %v615_v40 = vld [vmem:[#allocation7 + $0xa4] ss:$8 sps:$4 sm:$0xff]   ;;  %v617_v41 = vld [vmem:[#allocation7 + $0xa0] ss:$8 sps:$4 sm:$0xff]   ;;  %v618_v42 = vld [vmem:[#allocation7 + $0xb4] ss:$8 sps:$4 sm:$0xff]  }
  0x44   :  { %181 = vmatpush1.bf16.msra.mxu0 %v572_v8  ;;  %432 = vmatpush1.bf16.msra.mxu1 %v593_v18  ;;  %v620_v43 = vld [vmem:[#allocation7 + $0xb0] ss:$8 sps:$4 sm:$0xff]   ;;  %v621_v44 = vld [vmem:[#allocation7 + $0xc4] ss:$8 sps:$4 sm:$0xff]   ;;  %v623_v45 = vld [vmem:[#allocation7 + $0xc0] ss:$8 sps:$4 sm:$0xff]  }
  0x45   :  { %182 = vmatprep.subr.bf16.mxu0 %v573_v9  ;;  %433 = vmatprep.subr.bf16.mxu1 %v594_v20  ;;  %v624_v46 = vld [vmem:[#allocation7 + $0xd4] ss:$8 sps:$4 sm:$0xff]   ;;  %v626_v47 = vld [vmem:[#allocation7 + $0xd0] ss:$8 sps:$4 sm:$0xff]   ;;  %v627_v48 = vld [vmem:[#allocation7 + $0xe4] ss:$8 sps:$4 sm:$0xff]  }
  0x46   :  { %v629_v49 = vld [vmem:[#allocation7 + $0xe0] ss:$8 sps:$4 sm:$0xff]   ;;  %v630_v50 = vld [vmem:[#allocation7 + $0xf4] ss:$8 sps:$4 sm:$0xff]   ;;  %v632_v51 = vld [vmem:[#allocation7 + $0xf0] ss:$8 sps:$4 sm:$0xff]  }
  0x47   :  { %v86_v54 = vsub.s32 0, %v85_v53  ;;  %v82_v55 = vld [vmem:[%s839_s2] sm:$0x3]  ;;  %v90_v56 = vsub.s32 1, %v85_v53  ;;  %s733_s8 = smov [#allocation8]  }
  0x48   :  { %183 = vmatpush1.bf16.msra.mxu0 %v575_v13  ;;  %434 = vmatpush1.bf16.msra.mxu1 %v596_v22  ;;  %v255_v9 = vld [vmem:[%s841_s4] sm:$0x3]  ;;  %s489_s9 = sshll.u32 %s733_s8, 4  ;;  %s490_s9 = int_to_ptr.vmem [resolvable:$true] %s489_s9 }
  0x49   :  { %184 = vmatprep.subr.bf16.mxu0 %v576_v15  ;;  %435 = vmatprep.subr.bf16.mxu1 %v597_v24  ;;  %v87_v57 = vrot.slane %v82_v55, %v86_v54  ;;  %v91_v58 = vrot.slane %v82_v55, %v90_v56  ;;  %v260_v10 = vrot.slane %v255_v9, %v86_v54  ;;  %s699_s10 = scalar_lea.vmem %s490_s9, 256  ;;  %p704_p11 = scmp.lt.s32.totalorder %s490_s9, %s490_s9 }
  0x4a   :  { %v264_v11 = vrot.slane %v255_v9, %v90_v56  ;;  %p700_p10 = scmp.ne.s32.totalorder %s490_s9, %s699_s10  ;;  %p705_p12 = scmp.lt.s32.totalorder %s699_s10, %s699_s10 }
  0x4c   :  { %185 = vmatpush1.bf16.msra.mxu0 %v578_v17  ;;  %436 = vmatpush1.bf16.msra.mxu1 %v599_v28  ;;  %p706_p13 = por %p705_p12, %p704_p11 }
  0x4d   :  { %186 = vmatprep.subr.bf16.mxu0 %v579_v19  ;;  %437 = vmatprep.subr.bf16.mxu1 %v600_v29 }
  0x4e   :  { %p707_p0 = pnand %p706_p13, %p700_p10 }
  0x50   :  { %187 = vmatpush1.bf16.msra.mxu0 %v581_v21  ;;  %438 = vmatpush1.bf16.msra.mxu1 %v602_v31 }
  0x51   :  { %188 = vmatprep.subr.bf16.mxu0 %v582_v23  ;;  %439 = vmatprep.subr.bf16.mxu1 %v603_v32 }
  0x54   :  { %189 = vmatpush1.bf16.msra.mxu0 %v584_v25  ;;  %440 = vmatpush1.bf16.msra.mxu1 %v605_v33 }
  0x55   :  { %441 = vmatprep.subr.bf16.mxu1 %v606_v34 }
  0x57   :  { %207 = vmatmul.mubr.bf16.vlgmr.msra.gmra.mrb[0].mxu0 %v65_v30 }
  0x58   :  { %442 = vmatpush1.bf16.msra.mxu1 %v608_v35 }
  0x59   :  { %443 = vmatprep.subr.bf16.mxu1 %v609_v36 }
  0x5c   :  { %444 = vmatpush1.bf16.msra.mxu1 %v611_v37 }
  0x5d   :  { %445 = vmatprep.subr.bf16.mxu1 %v612_v38 }
  0x60   :  { %446 = vmatpush1.bf16.msra.mxu1 %v614_v39 }
  0x61   :  { %447 = vmatprep.subr.bf16.mxu1 %v615_v40 }
  0x64   :  { %448 = vmatpush1.bf16.msra.mxu1 %v617_v41 }
  0x65   :  { %449 = vmatprep.subr.bf16.mxu1 %v618_v42 }
  0x68   :  { %450 = vmatpush1.bf16.msra.mxu1 %v620_v43 }
  0x69   :  { %451 = vmatprep.subr.bf16.mxu1 %v621_v44 }
  0x6c   :  { %452 = vmatpush1.bf16.msra.mxu1 %v623_v45 }
  0x6d   :  { %453 = vmatprep.subr.bf16.mxu1 %v624_v46 }
  0x70   :  { %454 = vmatpush1.bf16.msra.mxu1 %v626_v47 }
  0x71   :  { %455 = vmatprep.subr.bf16.mxu1 %v627_v48 }
  0x74   :  { %456 = vmatpush1.bf16.msra.mxu1 %v629_v49 }
  0x75   :  { %457 = vmatprep.subr.bf16.mxu1 %v630_v50 }
  0x78   :  { %458 = vmatpush1.bf16.msra.mxu1 %v632_v51 }
 0x12a   :  { %v208_v59 = vpop.f32.mrb[0].mxu0 }
 0x12b   :  { %v209_v60 = vadd.f32 %v208_v59, %v87_v57  ;;  %v210_v61 = vpop.f32.mrb[1].mxu0 }
 0x12c   :  { %v211_v62 = vadd.f32 %v210_v61, %v91_v58  ;;  %v212_v63 = vpop.f32.mrb[2].mxu0 }
 0x12d   :  { %v213_v0 = vadd.f32 %v212_v63, %v87_v57  ;;  %v214_v1 = vpop.f32.mrb[3].mxu0  ;;  %v217_v3 = vmax.f32 %v209_v60, 0.0 }
 0x12e   :  { %v215_v2 = vadd.f32 %v214_v1, %v91_v58  ;;  %v218_v5 = vmax.f32 %v211_v62, 0.0 }
 0x12f   :  { %v219_v4 = vmax.f32 %v213_v0, 0.0 }
 0x130   :  { %v220_v6 = vmax.f32 %v215_v2, 0.0 }
 0x131   :  { %v221_v7 = vpack.c.bf16 %v219_v4, %v217_v3 }
 0x132   :  { %v222_v8 = vpack.c.bf16 %v220_v6, %v218_v5 }
 0x134   :  { %459 = vmatprep.mubr.bf16.mxu1 %v222_v8 }
 0x135   :  { %460 = vmatmul.mubr.bf16.vlgmr.msra.gmra.mrb[0].mxu1 %v221_v7 }
 0x208   :  { %v461_v12 = vpop.f32.mrb[0].mxu1 }
 0x209   :  { %v462_v13 = vadd.f32 %v461_v12, %v260_v10  ;;  %v463_v14 = vpop.f32.mrb[1].mxu1 }
 0x20a   :  { %v464_v15 = vadd.f32 %v463_v14, %v264_v11  ;;  %v465_v16 = vpop.f32.mrb[2].mxu1 }
 0x20b   :  { %v466_v17 = vadd.f32 %v465_v16, %v260_v10  ;;  %v467_v18 = vpop.f32.mrb[3].mxu1 }
 0x20c   :  { %v552_v19 = vpack.c.bf16 %v464_v15, %v462_v13  ;;  %v468_v20 = vadd.f32 %v467_v18, %v264_v11 }
 0x20e   :  { %482 = vst [vmem:[#allocation8] sm:$0xff] %v552_v19  ;;  %v553_v21 = vpack.c.bf16 %v468_v20, %v466_v17 }
 0x210   :  { %483 = vst [vmem:[#allocation8 + $0x8] sm:$0xff] %v553_v21 }
 0x211   :  { %710 = shalt.err (!%p707_p0)
}
 0x212   :  { %s711_s12 = scalar_lea.hbm %s842_s5, 256 }
 0x213   :  { %p712_p1 = scmp.ne.s32.totalorder %s842_s5, %s711_s12  ;;  %p715_p2 = scmp.lt.u32.totalorder %s711_s12, %s842_s5 }
 0x215   :  { %p717_p3 = pnand %p715_p2, %p712_p1 }
 0x217   :  { %720 = shalt.err (!%p717_p3)
}
 0x218   :  { %495 = dma.vmem_to_hbm [thread:$0]  %s490_s9, 256, %s842_s5, [#allocation4], %s729_s30, %s729_s30, %s730_s6  }
 0x219   :  { %725 = dma.done.wait [#allocation4], 256  }
 0x21a   :  { %726 = vsyncadd [#allocation4], 4294967040 }
 0x21b   :  { %499 = vsyncpa [#allocation3], 1 }
 0x21c   :  { %500 = vsyncpa [#allocation6], 1 }
 0x21d   :  { %501 = vsyncpa [#allocation4], 1 }

</bundles_post_ra>
